<compile_context>
chip_gen: v5e
topology: v5e:2x2
jax: 0.10.0
libtpu: 0.0.40
codegen_flags: <defaults>
</compile_context>

<pallas_src>
import jax
import jax.numpy as jnp
from jax.experimental import pallas as pl
from jax.experimental.pallas import tpu as pltpu


def _round_up(x, m):
    return ((x + m - 1) // m) * m


def _mlp_kernel(x_ref, w1_ref, b1_ref, w2_ref, b2_ref, o_ref):
    # Layer 1: f32 x f32 -> f32 accumulate on the MXU (mem-bound kernel, so the
    # f32 dots are free and keep near-exact parity with the f32 module).
    h = jnp.dot(x_ref[...], w1_ref[...], preferred_element_type=jnp.float32)
    # Bias + ReLU in f32 on the VPU (required path on v5e: no bf16 VPU).
    h = jnp.maximum(h + b1_ref[...], 0.0)
    # Layer 2 + bias; store only the real num_emotions lanes (no 128-padding).
    o = jnp.dot(h, w2_ref[...], preferred_element_type=jnp.float32) + b2_ref[...]
    o_ref[...] = o.astype(o_ref.dtype)


def _vmem_tile_bytes(tile_b, K, H, E):
    # VMEM footprint with lane(128)/sublane(8) padding, double-buffered
    # inputs/outputs (BlockSpec pipeline) plus the f32 intermediate h.
    Kp, Hp, Ep = _round_up(K, 128), _round_up(H, 128), _round_up(E, 128)
    x_t = tile_b * Kp * 4
    o_t = tile_b * Ep * 4
    w = Kp * Hp * 4 + Hp * Ep * 4 + 8 * Hp * 4 + 8 * Ep * 4
    h_t = tile_b * Hp * 4
    return 2 * (x_t + o_t + w) + h_t


def _tiling(B, K, H, E):
    """Pick (tile_b, n_steps, vmem_capacity).

    Big tiles (mem-/overhead-bound: ~0.35us fixed cost per grid step), but at
    least 2 grid steps when B > 64 so both v7x TensorCores get work, and the
    batch is split evenly to minimize padding rows.
    """
    try:
        vmem_cap = int(pltpu.get_tpu_info().vmem_capacity_bytes)
    except Exception:  # conservative fallback if the query is unavailable
        vmem_cap = 64 * 1024 * 1024
    # v7x-class chips (64 MiB VMEM, ~3.2 TB/s HBM) want bigger tiles; 1024 is
    # the sweet spot on v5e/v6e.
    target = 2048 if vmem_cap <= 64 * 1024 * 1024 else 1024
    if B <= 64:
        n_steps = 1
    else:
        n_steps = max(2, pl.cdiv(B, target))
    tile_b = _round_up(pl.cdiv(B, n_steps), 8)
    # Keep the double-buffered working set comfortably inside VMEM even for
    # very large latent_dim: shrink the tile (more grid steps) if needed.
    budget = int(0.55 * vmem_cap)
    while _vmem_tile_bytes(tile_b, K, H, E) > budget and tile_b > 8:
        n_steps *= 2
        tile_b = _round_up(pl.cdiv(B, n_steps), 8)
    return tile_b, n_steps, vmem_cap


def emotion_adversarial_discriminator(x, params):
    """Forward pass matching the PyTorch module.

    x: (B, latent_dim)
    params: w1 (latent_dim, 128), b1 (128,), w2 (128, num_emotions), b2 (E,)
    Weights stored (in_features, out_features) so y = x @ W + b matches
    PyTorch's y = x @ W_pt.T + b.
    """
    B, K = x.shape
    w1, b1 = params["w1"], params["b1"]
    w2, b2 = params["w2"], params["b2"]
    H = w1.shape[1]      # 128 hidden units
    E = w2.shape[1]      # num_emotions (kept un-padded end to end)

    tile_b, n_steps, vmem_cap = _tiling(B, K, H, E)
    B_pad = tile_b * n_steps

    xf = x.astype(jnp.float32)
    if B_pad != B:
        xf = jnp.pad(xf, ((0, B_pad - B), (0, 0)))
    w1f = w1.astype(jnp.float32)
    w2f = w2.astype(jnp.float32)
    b1f = jnp.reshape(b1, (1, H)).astype(jnp.float32)
    b2f = jnp.reshape(b2, (1, E)).astype(jnp.float32)

    flops = 2 * B_pad * (K * H + H * E)
    bytes_accessed = (B_pad * K + K * H + H * E + H + E + B_pad * E) * 4

    vmem_need = _vmem_tile_bytes(tile_b, K, H, E)
    cap = 100 * 1024 * 1024 if vmem_cap > 64 * 1024 * 1024 else 48 * 1024 * 1024
    vmem_limit = int(min(cap, max(32 * 1024 * 1024, 2 * vmem_need)))

    out = pl.pallas_call(
        _mlp_kernel,
        out_shape=jax.ShapeDtypeStruct((B_pad, E), jnp.float32),
        grid_spec=pl.GridSpec(
            grid=(n_steps,),
            in_specs=[
                pl.BlockSpec((tile_b, K), lambda i: (i, 0)),  # x tile (full K)
                pl.BlockSpec((K, H), lambda i: (0, 0)),       # w1 (resident)
                pl.BlockSpec((1, H), lambda i: (0, 0)),       # b1
                pl.BlockSpec((H, E), lambda i: (0, 0)),       # w2 (resident)
                pl.BlockSpec((1, E), lambda i: (0, 0)),       # b2
            ],
            out_specs=pl.BlockSpec((tile_b, E), lambda i: (i, 0)),
        ),
        compiler_params=pltpu.CompilerParams(
            dimension_semantics=("parallel",),
            vmem_limit_bytes=vmem_limit,
        ),
        cost_estimate=pl.CostEstimate(
            flops=flops, transcendentals=0, bytes_accessed=bytes_accessed
        ),
    )(xf, w1f, b1f, w2f, b2f)

    if B_pad != B:
        out = out[:B]
    return out.astype(x.dtype)


def init_params(key, latent_dim, num_emotions):
    """Deterministic synthetic parameters (same shapes as the PyTorch module)."""
    k1, k2, k3, k4 = jax.random.split(key, 4)
    scale = 0.05
    return {
        "w1": scale * jax.random.normal(k1, (latent_dim, 128), jnp.float32),
        "b1": scale * jax.random.normal(k2, (128,), jnp.float32),
        "w2": scale * jax.random.normal(k3, (128, num_emotions), jnp.float32),
        "b2": scale * jax.random.normal(k4, (num_emotions,), jnp.float32),
    }


def _reference(x, p):
    h = jnp.maximum(x @ p["w1"] + p["b1"], 0.0)
    return h @ p["w2"] + p["b2"]


if __name__ == "__main__":
    latent_dim = 32
    num_emotions = 8
    batch = 16

    key = jax.random.PRNGKey(0)
    kx, kp = jax.random.split(key)
    x = jax.random.normal(kx, (batch, latent_dim), jnp.float32)
    params = init_params(kp, latent_dim, num_emotions)

    out = emotion_adversarial_discriminator(x, params)
    out = jax.block_until_ready(out)

    ref = _reference(x, params)
    assert out.shape == (batch, num_emotions)
    # f32 in-kernel matmuls -> near-exact; tolerance covers MXU rounding modes.
    assert jnp.allclose(out, ref, atol=2e-2, rtol=2e-2), (
        float(jnp.max(jnp.abs(out - ref)))
    )

    print("KERNEL_OK")
</pallas_src>

<mosaic_0001>
module attributes {stable_mosaic.version = 11 : i64} {
  func.func @_mlp_kernel(%arg0: i32, %arg1: memref<16x32xf32, #tpu.memory_space<vmem>>, %arg2: memref<32x128xf32, #tpu.memory_space<vmem>>, %arg3: memref<1x128xf32, #tpu.memory_space<vmem>>, %arg4: memref<128x8xf32, #tpu.memory_space<vmem>>, %arg5: memref<1x8xf32, #tpu.memory_space<vmem>>, %arg6: memref<16x8xf32, #tpu.memory_space<vmem>>) attributes {dimension_semantics = [#tpu.dimension_semantics<parallel>], iteration_bounds = array<i64: 1>, scalar_prefetch = 0 : i64, scratch_operands = 0 : i64, tpu.core_type = #tpu.core_type<tc>, window_params = [{transform_indices = @transform_0, window_bounds = array<i64: 16, 32>}, {pipeline_mode = #tpu.pipeline_mode<synchronous>, transform_indices = @transform_1, window_bounds = array<i64: 32, 128>}, {pipeline_mode = #tpu.pipeline_mode<synchronous>, transform_indices = @transform_2, window_bounds = array<i64: 1, 128>}, {pipeline_mode = #tpu.pipeline_mode<synchronous>, transform_indices = @transform_3, window_bounds = array<i64: 128, 8>}, {pipeline_mode = #tpu.pipeline_mode<synchronous>, transform_indices = @transform_4, window_bounds = array<i64: 1, 8>}, {transform_indices = @transform_5, window_bounds = array<i64: 16, 8>}]} {
    %c0 = arith.constant 0 : index
    %c0_0 = arith.constant 0 : index
    %0 = vector.load %arg1[%c0, %c0_0] : memref<16x32xf32, #tpu.memory_space<vmem>>, vector<16x32xf32>
    %c0_1 = arith.constant 0 : index
    %c0_2 = arith.constant 0 : index
    %1 = vector.load %arg2[%c0_1, %c0_2] : memref<32x128xf32, #tpu.memory_space<vmem>>, vector<32x128xf32>
    %cst = arith.constant dense<0.000000e+00> : vector<16x128xf32>
    %2 = tpu.matmul %0, %1, %cst {dimension_numbers = #tpu.dot_dimension_numbers<[1], [0], [0], [1], [0, 0, 1, 1], [], []>} : vector<16x32xf32>, vector<32x128xf32>, vector<16x128xf32> -> vector<16x128xf32>
    %c0_3 = arith.constant 0 : index
    %c0_4 = arith.constant 0 : index
    %3 = vector.load %arg3[%c0_3, %c0_4] : memref<1x128xf32, #tpu.memory_space<vmem>>, vector<1x128xf32>
    %4 = vector.broadcast %3 : vector<1x128xf32> to vector<16x128xf32>
    %5 = arith.addf %2, %4 : vector<16x128xf32>
    %cst_5 = arith.constant 0.000000e+00 : f32
    %6 = vector.broadcast %cst_5 : f32 to vector<16x128xf32>
    %7 = arith.maximumf %5, %6 : vector<16x128xf32>
    %c0_6 = arith.constant 0 : index
    %c0_7 = arith.constant 0 : index
    %8 = vector.load %arg4[%c0_6, %c0_7] : memref<128x8xf32, #tpu.memory_space<vmem>>, vector<128x8xf32>
    %cst_8 = arith.constant dense<0.000000e+00> : vector<16x8xf32>
    %9 = tpu.matmul %7, %8, %cst_8 {dimension_numbers = #tpu.dot_dimension_numbers<[1], [0], [0], [1], [0, 0, 1, 1], [], []>} : vector<16x128xf32>, vector<128x8xf32>, vector<16x8xf32> -> vector<16x8xf32>
    %c0_9 = arith.constant 0 : index
    %c0_10 = arith.constant 0 : index
    %10 = vector.load %arg5[%c0_9, %c0_10] : memref<1x8xf32, #tpu.memory_space<vmem>>, vector<1x8xf32>
    %11 = vector.broadcast %10 : vector<1x8xf32> to vector<16x8xf32>
    %12 = arith.addf %9, %11 : vector<16x8xf32>
    %c0_11 = arith.constant 0 : index
    %c0_12 = arith.constant 0 : index
    %13 = vector.load %arg6[%c0_11, %c0_12] : memref<16x8xf32, #tpu.memory_space<vmem>>, vector<16x8xf32>
    tpu.vector_store %arg6[%c0_11, %c0_12], %12 {strides = array<i32>} : memref<16x8xf32, #tpu.memory_space<vmem>>, vector<16x8xf32>,
    return
  }
  func.func @transform_0(%arg0: i32) -> (i32, i32) {
    %c0_i32 = arith.constant 0 : i32
    %c0_i32_0 = arith.constant 0 : i32
    return %arg0, %c0_i32 : i32, i32
  }
  func.func @transform_1(%arg0: i32) -> (i32, i32) {
    %c0_i32 = arith.constant 0 : i32
    %c0_i32_0 = arith.constant 0 : i32
    %c0_i32_1 = arith.constant 0 : i32
    return %c0_i32, %c0_i32_0 : i32, i32
  }
  func.func @transform_2(%arg0: i32) -> (i32, i32) {
    %c0_i32 = arith.constant 0 : i32
    %c0_i32_0 = arith.constant 0 : i32
    %c0_i32_1 = arith.constant 0 : i32
    return %c0_i32, %c0_i32_0 : i32, i32
  }
  func.func @transform_3(%arg0: i32) -> (i32, i32) {
    %c0_i32 = arith.constant 0 : i32
    %c0_i32_0 = arith.constant 0 : i32
    %c0_i32_1 = arith.constant 0 : i32
    return %c0_i32, %c0_i32_0 : i32, i32
  }
  func.func @transform_4(%arg0: i32) -> (i32, i32) {
    %c0_i32 = arith.constant 0 : i32
    %c0_i32_0 = arith.constant 0 : i32
    %c0_i32_1 = arith.constant 0 : i32
    return %c0_i32, %c0_i32_0 : i32, i32
  }
  func.func @transform_5(%arg0: i32) -> (i32, i32) {
    %c0_i32 = arith.constant 0 : i32
    %c0_i32_0 = arith.constant 0 : i32
    return %arg0, %c0_i32 : i32, i32
  }
}

</mosaic_0001>

<bundles_post_ra>
// kernel: tpu_custom_call.1
= control target key start
LH: loop header
LB: loop body
LE: loop exit
PB: predicated region body
PF: predicated region fallthrough
CT: control target
= control target key end

     0   :  { %vm30_vm0 = vcmask 261120   ;;  %vm105_vm1 = vcmask 64512   ;;  %s242_s1 = inlined_call_operand.vmem [shape: f32[32,128], index: 1, kind: input, shape index: {}]   ;;  %s243_s3 = inlined_call_operand.vmem [shape: f32[128,8], index: 3, kind: input, shape index: {}]   ;;  %s244_s0 = inlined_call_operand.vmem [shape: f32[16,32], index: 0, kind: input, shape index: {}]   ;;  %s245_s2 = inlined_call_operand.vmem [shape: f32[1,128], index: 2, kind: input, shape index: {}]   ;;  %s246_s4 = inlined_call_operand.vmem [shape: f32[1,8], index: 4, kind: input, shape index: {}]   ;;  %s247_s5 = inlined_call_operand.vmem [shape: f32[16,8], index: 5, kind: output, shape index: {}]  }
   0x1   :  { %v25_v0 = vld [vmem:[%s242_s1 + $0x18] sm:$0xff]  ;;  %v24_v1 = vld [vmem:[%s242_s1 + $0x10] sm:$0xff]  ;;  %v23_v2 = vld [vmem:[%s242_s1 + $0x8] sm:$0xff] }
   0x2   :  { %49 = vmatpush.msra.mxu0 %v25_v0  ;;  %v77_v3 = vld [vmem:[%s243_s3 + $0x78] sm:$0xff]  ;;  %v76_v4 = vld [vmem:[%s243_s3 + $0x70] sm:$0xff]  ;;  %v22_v5 = vld [vmem:[%s242_s1] sm:$0xff] }
   0x3   :  { %82 = vmatpush.msra.mxu1 %v77_v3  ;;  %v75_v6 = vld [vmem:[%s243_s3 + $0x68] sm:$0xff]  ;;  %114 = vmatpush.msra.mxu2 %v77_v3  ;;  %v20_v7 = vld [vmem:[%s244_s0] sm:$0xff]  ;;  %v73_v9 = vld [vmem:[%s243_s3 + $0x58] sm:$0xff] }
   0x4   :  { %50 = vmatpush.msra.mxu0 %v24_v1  ;;  %v74_v8 = vld [vmem:[%s243_s3 + $0x60] sm:$0xff]  ;;  %v72_v10 = vld [vmem:[%s243_s3 + $0x50] sm:$0xff]  ;;  %v71_v11 = vld [vmem:[%s243_s3 + $0x48] sm:$0xff] }
   0x5   :  { %83 = vmatpush.msra.mxu1 %v76_v4  ;;  %115 = vmatpush.msra.mxu2 %v76_v4  ;;  %v21_v12 = vld [vmem:[%s244_s0 + $0x8] sm:$0xff]  ;;  %v70_v13 = vld [vmem:[%s243_s3 + $0x40] sm:$0xff]  ;;  %v69_v14 = vld [vmem:[%s243_s3 + $0x38] sm:$0xff] }
   0x6   :  { %51 = vmatpush.msra.mxu0 %v23_v2  ;;  %v68_v15 = vld [vmem:[%s243_s3 + $0x30] sm:$0xff]  ;;  %v67_v16 = vld [vmem:[%s243_s3 + $0x28] sm:$0xff]  ;;  %v66_v17 = vld [vmem:[%s243_s3 + $0x20] sm:$0xff] }
   0x7   :  { %84 = vmatpush.msra.mxu1 %v75_v6  ;;  %116 = vmatpush.msra.mxu2 %v75_v6  ;;  %v65_v18 = vld [vmem:[%s243_s3 + $0x18] sm:$0xff]  ;;  %v64_v19 = vld [vmem:[%s243_s3 + $0x10] sm:$0xff]  ;;  %v63_v20 = vld [vmem:[%s243_s3 + $0x8] sm:$0xff] }
   0x8   :  { %52 = vmatpush.msra.mxu0 %v22_v5  ;;  %v62_v21 = vld [vmem:[%s243_s3] sm:$0xff] }
   0x9   :  { %112 = vmatmul.msk.f32.vlgmr.msra.gmra.mxu0 %vm30_vm0, %v20_v7  ;;  %85 = vmatpush.msra.mxu1 %v74_v8  ;;  %v130_v22 = vld [vmem:[%s245_s2] ss:$0 sm:$0xff] }
   0xa   :  { %117 = vmatpush.msra.mxu2 %v74_v8  ;;  %v131_v29 = vld [vmem:[%s246_s4] ss:$0 sm:$0xff] }
   0xb   :  { %86 = vmatpush.msra.mxu1 %v73_v9 }
   0xc   :  { %118 = vmatpush.msra.mxu2 %v73_v9 }
   0xd   :  { %87 = vmatpush.msra.mxu1 %v72_v10 }
   0xe   :  { %119 = vmatpush.msra.mxu2 %v72_v10 }
   0xf   :  { %88 = vmatpush.msra.mxu1 %v71_v11 }
  0x10   :  { %120 = vmatpush.msra.mxu2 %v71_v11 }
  0x11   :  { %113 = vmatmul.msk.f32.gmra.mxu0 %vm30_vm0, %v21_v12  ;;  %89 = vmatpush.msra.mxu1 %v70_v13 }
  0x12   :  { %121 = vmatpush.msra.mxu2 %v70_v13 }
  0x13   :  { %90 = vmatpush.msra.mxu1 %v69_v14 }
  0x14   :  { %122 = vmatpush.msra.mxu2 %v69_v14 }
  0x15   :  { %91 = vmatpush.msra.mxu1 %v68_v15 }
  0x16   :  { %123 = vmatpush.msra.mxu2 %v68_v15 }
  0x17   :  { %92 = vmatpush.msra.mxu1 %v67_v16 }
  0x18   :  { %124 = vmatpush.msra.mxu2 %v67_v16 }
  0x19   :  { %93 = vmatpush.msra.mxu1 %v66_v17 }
  0x1a   :  { %125 = vmatpush.msra.mxu2 %v66_v17 }
  0x1b   :  { %94 = vmatpush.msra.mxu1 %v65_v18 }
  0x1c   :  { %126 = vmatpush.msra.mxu2 %v65_v18 }
  0x1d   :  { %95 = vmatpush.msra.mxu1 %v64_v19 }
  0x1e   :  { %127 = vmatpush.msra.mxu2 %v64_v19 }
  0x1f   :  { %96 = vmatpush.msra.mxu1 %v63_v20 }
  0x20   :  { %128 = vmatpush.msra.mxu2 %v63_v20 }
  0x21   :  { %97 = vmatpush.msra.mxu1 %v62_v21 }
  0x22   :  { %129 = vmatpush.msra.mxu2 %v62_v21 }
  0x86   :  { %v54_v23 = vpop.f32.mrf.mxu0 }
  0x87   :  { %v55_v24 = vadd.f32 %v130_v22, %v54_v23 }
  0x89   :  { %v60_v25 = vmax.f32 %v55_v24, 0.0 }
  0x8b   :  { %98 = vmatmul.f32.vlgmr.msra.gmra.mxu1 %v60_v25 }
  0x8e   :  { %v57_v26 = vpop.f32.mrf.mxu0 }
  0x8f   :  { %v58_v27 = vadd.f32 %v130_v22, %v57_v26 }
  0x91   :  { %v61_v28 = vmax.f32 %v58_v27, 0.0 }
  0x93   :  { %101 = vmatmul.f32.vlgmr.msra.gmra.mxu2 %v61_v28 }
 0x108   :  { %v99_v30 = vpop.f32.mrf.mxu1 }
 0x109   :  { %v100_v31 = vadd.f32 %v131_v29, %v99_v30 }
 0x10b   :  { %106 = vst.msk [vmem:[%s247_s5] sm:$0xff] %vm105_vm1, %v100_v31 }
 0x116   :  { %v102_v32 = vpop.f32.mrf.mxu2 }
 0x117   :  { %v103_v33 = vadd.f32 %v131_v29, %v102_v32 }
 0x119   :  { %107 = vst.msk [vmem:[%s247_s5 + $0x8] sm:$0xff] %vm105_vm1, %v103_v33 }

</bundles_post_ra>
